<compile_context>
chip_gen: v7x
topology: tpu7x:2x2x1
jax: 0.10.0
libtpu: 0.0.40
codegen_flags: <defaults>
</compile_context>

<pallas_src>
import functools

import jax
import jax.numpy as jnp
import numpy as np
from jax import lax
from jax.experimental import pallas as pl
from jax.experimental.pallas import tpu as pltpu


def _decoder_block_kernel(x_ref, w1_ref, b1_ref, w2_ref, b2_ref, o_ref,
                          xpad_ref, ypad_ref, *, H, W):
    """Fused DecoderBlock for one batch element.

    x_ref   : (1, H, W*Cin)            f32   input rows, lane-dense (w, ci) packing
    w1_ref  : (3, W*Cin, W*Cmid)       bf16  conv1 banded (block-Toeplitz) matrices, one per kh
    b1_ref  : (1, W*Cmid)              f32   conv1 bias broadcast over w
    w2_ref  : (2, 2, W*Cmid, 2*W*Cout) bf16  transposed-conv polyphase matrices, [rh, dh]
    b2_ref  : (1, 2*W*Cout)            f32   conv2 bias broadcast over output columns
    o_ref   : (1, 2, H, 2*W*Cout)      f32   output rows, split by output-row parity rh
    xpad_ref: (H+2, W*Cin)             f32   VMEM scratch, H-padded input
    ypad_ref: (H+2, W*Cmid)            f32   VMEM scratch, H-padded conv1 output
    """
    f32 = jnp.float32
    bf16 = jnp.bfloat16

    # ---- in-kernel zero padding of the H boundary (W boundary is folded into the weights) ----
    xpad_ref[...] = jnp.zeros_like(xpad_ref)
    xpad_ref[1:H + 1, :] = x_ref[0]

    # ---- Conv2d(3x3, s1, p1) + bias + ReLU: 3 lane-dense MXU matmuls, f32 accumulation ----
    acc = jnp.dot(xpad_ref[0:H, :].astype(bf16), w1_ref[0], preferred_element_type=f32)
    acc = acc + jnp.dot(xpad_ref[1:H + 1, :].astype(bf16), w1_ref[1], preferred_element_type=f32)
    acc = acc + jnp.dot(xpad_ref[2:H + 2, :].astype(bf16), w1_ref[2], preferred_element_type=f32)
    y = jnp.maximum(acc + b1_ref[...], 0.0)                         # (H, W*Cmid), f32

    # intermediate stays in VMEM; rows 0 and H+1 are the zero padding for the transposed conv
    ypad_ref[...] = jnp.zeros_like(ypad_ref)
    ypad_ref[1:H + 1, :] = y

    # ---- ConvTranspose2d(4x4, s2, p1) + bias + ReLU, polyphase over output-row parity rh ----
    # out_row[2p+rh] = ReLU( ypad[p+rh] @ A[rh,0] + ypad[p+rh+1] @ A[rh,1] + b2 )
    for rh in range(2):
        acc2 = jnp.dot(ypad_ref[rh:rh + H, :].astype(bf16), w2_ref[rh, 0],
                       preferred_element_type=f32)
        acc2 = acc2 + jnp.dot(ypad_ref[rh + 1:rh + 1 + H, :].astype(bf16), w2_ref[rh, 1],
                              preferred_element_type=f32)
        z = jnp.maximum(acc2 + b2_ref[...], 0.0)                    # (H, 2*W*Cout)
        o_ref[0, rh] = z.astype(o_ref.dtype)


def _conv1_banded_weights(w1, W):
    """Fold the 3 kw taps + W padding=1 into banded matrices B[kh] of shape (W*Cin, W*Cmid).

    B[kh][iw*Cin+ci, ow*Cmid+cm] = w1[cm, ci, kh, iw-ow+1]  (zero outside the band).
    """
    Cmid, Cin, K, _ = w1.shape                      # torch Conv2d layout (out, in, kh, kw)
    ind = np.zeros((K, W, W), np.float32)           # [kw, iw, ow]
    for kw in range(K):
        for ow in range(W):
            iw = ow + kw - 1                        # padding = 1
            if 0 <= iw < W:
                ind[kw, iw, ow] = 1.0
    b = jnp.einsum("wio,mchw->hicom", ind, w1)      # (kh, iw, ci, ow, cm)
    return b.reshape(K, W * Cin, W * Cmid)


def _conv2_polyphase_weights(w2, W):
    """ConvTranspose2d(k=4, s=2, p=1) as 4 polyphase 2x2 convs folded (with W padding and the
    output-column interleave) into matrices A[rh, dh] of shape (W*Cmid, 2*W*Cout).

    z[2p+rh, 2q+rw, co] = sum_{dh,dw,ci} y[p+rh+dh-1, q+rw+dw-1, ci] * w2[ci, co, 3-rh-2dh, 3-rw-2dw]
    A[rh, dh][iw*Cmid+ci, (2q+rw)*Cout+co] carries the (dw, kw) part with iw = q+rw+dw-1.
    """
    Cmid, Cout, _, _ = w2.shape                     # torch ConvTranspose2d layout (in, out, kh, kw)
    kmap = np.array([[3, 1], [2, 0]])               # tap used by phase r at offset d: 3 - r - 2d
    w2p = w2[:, :, kmap][:, :, :, :, kmap]          # (ci, co, rh, dh, rw, dw)
    ind = np.zeros((2, 2, W, W), np.float32)        # [rw, dw, iw, q]
    for rw in range(2):
        for dw in range(2):
            for q in range(W):
                iw = q + rw + dw - 1
                if 0 <= iw < W:
                    ind[rw, dw, iw, q] = 1.0
    a = jnp.einsum("sdiq,coresd->reicqso", ind, w2p)   # (rh, dh, iw, ci, q, rw, co)
    return a.reshape(2, 2, W * Cmid, 2 * W * Cout)


def init_params(key, in_depth, middle_depth, out_depth):
    """Deterministic synthetic parameters in PyTorch layouts."""
    k1, k2, k3, k4 = jax.random.split(key, 4)
    w1 = jax.random.normal(k1, (middle_depth, in_depth, 3, 3), jnp.float32) * 0.1   # OIHW
    b1 = jax.random.normal(k2, (middle_depth,), jnp.float32) * 0.1
    w2 = jax.random.normal(k3, (middle_depth, out_depth, 4, 4), jnp.float32) * 0.1  # (in,out,kH,kW)
    b2 = jax.random.normal(k4, (out_depth,), jnp.float32) * 0.1
    return dict(w1=w1, b1=b1, w2=w2, b2=b2)


@jax.jit
def decoder_block_pallas(x_nchw, params):
    w1, b1, w2, b2 = params["w1"], params["b1"], params["w2"], params["b2"]
    N, Cin, H, W = x_nchw.shape
    Cmid = w1.shape[0]
    Cout = w2.shape[1]

    # activations: NCHW -> lane-dense rows (N, H, W*Cin)
    x_rows = jnp.transpose(x_nchw, (0, 2, 3, 1)).reshape(N, H, W * Cin)

    # weights -> lane-dense banded matrices (tiny; built once per call), bf16 for the MXU
    w1_toe = _conv1_banded_weights(w1, W).astype(jnp.bfloat16)        # (3, W*Cin, W*Cmid)
    b1_row = jnp.tile(b1, W).reshape(1, W * Cmid).astype(jnp.float32)
    w2_toe = _conv2_polyphase_weights(w2, W).astype(jnp.bfloat16)     # (2, 2, W*Cmid, 2*W*Cout)
    b2_row = jnp.tile(b2, 2 * W).reshape(1, 2 * W * Cout).astype(jnp.float32)

    kernel = functools.partial(_decoder_block_kernel, H=H, W=W)
    z_packed = pl.pallas_call(
        kernel,
        out_shape=jax.ShapeDtypeStruct((N, 2, H, 2 * W * Cout), jnp.float32),
        grid=(N,),
        in_specs=[
            pl.BlockSpec((1, H, W * Cin), lambda n: (n, 0, 0)),
            pl.BlockSpec((3, W * Cin, W * Cmid), lambda n: (0, 0, 0)),
            pl.BlockSpec((1, W * Cmid), lambda n: (0, 0)),
            pl.BlockSpec((2, 2, W * Cmid, 2 * W * Cout), lambda n: (0, 0, 0, 0)),
            pl.BlockSpec((1, 2 * W * Cout), lambda n: (0, 0)),
        ],
        out_specs=pl.BlockSpec((1, 2, H, 2 * W * Cout), lambda n: (n, 0, 0, 0)),
        scratch_shapes=[
            pltpu.VMEM((H + 2, W * Cin), jnp.float32),    # H-padded input rows
            pltpu.VMEM((H + 2, W * Cmid), jnp.float32),   # H-padded conv1 output (stays in VMEM)
        ],
        compiler_params=pltpu.CompilerParams(dimension_semantics=("parallel",)),
    )(x_rows, w1_toe, b1_row, w2_toe, b2_row)

    # un-interleave the row-parity / column-phase packing -> NHWC -> NCHW (wrapper-side glue)
    z = z_packed.reshape(N, 2, H, 2 * W, Cout)                    # [n, rh, p, ow, co]
    z = jnp.transpose(z, (0, 2, 1, 3, 4)).reshape(N, 2 * H, 2 * W, Cout)
    return jnp.transpose(z, (0, 3, 1, 2))


def decoder_block_reference(x_nchw, params):
    """Pure-JAX f32 reference (lax convs), same math as torch DecoderBlock.forward."""
    w1, b1, w2, b2 = params["w1"], params["b1"], params["w2"], params["b2"]
    x = jnp.transpose(x_nchw, (0, 2, 3, 1))
    w1_hwio = jnp.transpose(w1, (2, 3, 1, 0))
    y = lax.conv_general_dilated(x, w1_hwio, (1, 1), ((1, 1), (1, 1)),
                                 dimension_numbers=("NHWC", "HWIO", "NHWC"))
    y = jax.nn.relu(y + b1)
    w2_hwio = jnp.transpose(w2, (2, 3, 0, 1))[::-1, ::-1]
    z = lax.conv_general_dilated(y, w2_hwio, (1, 1), ((2, 2), (2, 2)),
                                 lhs_dilation=(2, 2),
                                 dimension_numbers=("NHWC", "HWIO", "NHWC"))
    z = jax.nn.relu(z + b2)
    return jnp.transpose(z, (0, 3, 1, 2))


if __name__ == "__main__":
    # Small shapes: batch=2, in_depth=4, middle_depth=8, out_depth=4, spatial=16
    key = jax.random.PRNGKey(0)
    kp, kx = jax.random.split(key)
    params = init_params(kp, in_depth=4, middle_depth=8, out_depth=4)
    x = jax.random.normal(kx, (2, 4, 16, 16), jnp.float32)        # NCHW, like PyTorch

    out = jax.block_until_ready(decoder_block_pallas(x, params))
    assert out.shape == (2, 4, 32, 32), out.shape

    ref = jax.block_until_ready(decoder_block_reference(x, params))
    # bf16 matmul operands (f32 accumulation) vs. pure-f32 reference -> small deviation allowed
    np.testing.assert_allclose(np.asarray(out), np.asarray(ref), rtol=2e-2, atol=2e-2)

    print("KERNEL_OK")
</pallas_src>

<mosaic_0001>
module attributes {stable_mosaic.version = 11 : i64} {
  func.func @_decoder_block_kernel(%arg0: i32, %arg1: memref<1x16x64xf32, #tpu.memory_space<vmem>>, %arg2: memref<3x64x128xbf16, #tpu.memory_space<vmem>>, %arg3: memref<1x128xf32, #tpu.memory_space<vmem>>, %arg4: memref<2x2x128x128xbf16, #tpu.memory_space<vmem>>, %arg5: memref<1x128xf32, #tpu.memory_space<vmem>>, %arg6: memref<1x2x16x128xf32, #tpu.memory_space<vmem>>, %arg7: memref<18x64xf32, #tpu.memory_space<vmem>>, %arg8: memref<18x128xf32, #tpu.memory_space<vmem>>) attributes {dimension_semantics = [#tpu.dimension_semantics<parallel>], iteration_bounds = array<i64: 2>, scalar_prefetch = 0 : i64, scratch_operands = 2 : i64, tpu.core_type = #tpu.core_type<tc>, window_params = [{transform_indices = @transform_0, window_bounds = array<i64: 1, 16, 64>}, {pipeline_mode = #tpu.pipeline_mode<synchronous>, transform_indices = @transform_1, window_bounds = array<i64: 3, 64, 128>}, {pipeline_mode = #tpu.pipeline_mode<synchronous>, transform_indices = @transform_2, window_bounds = array<i64: 1, 128>}, {pipeline_mode = #tpu.pipeline_mode<synchronous>, transform_indices = @transform_3, window_bounds = array<i64: 2, 2, 128, 128>}, {pipeline_mode = #tpu.pipeline_mode<synchronous>, transform_indices = @transform_4, window_bounds = array<i64: 1, 128>}, {transform_indices = @transform_5, window_bounds = array<i64: 1, 2, 16, 128>}]} {
    %cst = arith.constant 0.000000e+00 : f32
    %0 = vector.broadcast %cst : f32 to vector<18x64xf32>
    %c0 = arith.constant 0 : index
    %c0_0 = arith.constant 0 : index
    %1 = vector.load %arg7[%c0, %c0_0] : memref<18x64xf32, #tpu.memory_space<vmem>>, vector<18x64xf32>
    tpu.vector_store %arg7[%c0, %c0_0], %0 {strides = array<i32>} : memref<18x64xf32, #tpu.memory_space<vmem>>, vector<18x64xf32>,
    %c0_1 = arith.constant 0 : index
    %c0_2 = arith.constant 0 : index
    %c0_3 = arith.constant 0 : index
    %2 = vector.load %arg1[%c0_1, %c0_2, %c0_3] : memref<1x16x64xf32, #tpu.memory_space<vmem>>, vector<1x16x64xf32>
    %3 = vector.shape_cast %2 : vector<1x16x64xf32> to vector<16x64xf32>
    %c1 = arith.constant 1 : index
    %c0_4 = arith.constant 0 : index
    %4 = vector.load %arg7[%c1, %c0_4] : memref<18x64xf32, #tpu.memory_space<vmem>>, vector<16x64xf32>
    tpu.vector_store %arg7[%c1, %c0_4], %3 {strides = array<i32>} : memref<18x64xf32, #tpu.memory_space<vmem>>, vector<16x64xf32>,
    %c0_5 = arith.constant 0 : index
    %c0_6 = arith.constant 0 : index
    %5 = vector.load %arg7[%c0_5, %c0_6] : memref<18x64xf32, #tpu.memory_space<vmem>>, vector<16x64xf32>
    %6 = arith.truncf %5 : vector<16x64xf32> to vector<16x64xbf16>
    %c0_7 = arith.constant 0 : index
    %c0_8 = arith.constant 0 : index
    %c0_9 = arith.constant 0 : index
    %7 = vector.load %arg2[%c0_7, %c0_8, %c0_9] : memref<3x64x128xbf16, #tpu.memory_space<vmem>>, vector<1x64x128xbf16>
    %8 = vector.shape_cast %7 : vector<1x64x128xbf16> to vector<64x128xbf16>
    %cst_10 = arith.constant dense<0.000000e+00> : vector<16x128xf32>
    %9 = tpu.matmul %6, %8, %cst_10 {dimension_numbers = #tpu.dot_dimension_numbers<[1], [0], [0], [1], [0, 0, 1, 1], [], []>} : vector<16x64xbf16>, vector<64x128xbf16>, vector<16x128xf32> -> vector<16x128xf32>
    %c1_11 = arith.constant 1 : index
    %c0_12 = arith.constant 0 : index
    %10 = vector.load %arg7[%c1_11, %c0_12] : memref<18x64xf32, #tpu.memory_space<vmem>>, vector<16x64xf32>
    %11 = arith.truncf %10 : vector<16x64xf32> to vector<16x64xbf16>
    %c1_13 = arith.constant 1 : index
    %c0_14 = arith.constant 0 : index
    %c0_15 = arith.constant 0 : index
    %12 = vector.load %arg2[%c1_13, %c0_14, %c0_15] : memref<3x64x128xbf16, #tpu.memory_space<vmem>>, vector<1x64x128xbf16>
    %13 = vector.shape_cast %12 : vector<1x64x128xbf16> to vector<64x128xbf16>
    %cst_16 = arith.constant dense<0.000000e+00> : vector<16x128xf32>
    %14 = tpu.matmul %11, %13, %cst_16 {dimension_numbers = #tpu.dot_dimension_numbers<[1], [0], [0], [1], [0, 0, 1, 1], [], []>} : vector<16x64xbf16>, vector<64x128xbf16>, vector<16x128xf32> -> vector<16x128xf32>
    %15 = arith.addf %9, %14 : vector<16x128xf32>
    %c2 = arith.constant 2 : index
    %c0_17 = arith.constant 0 : index
    %16 = vector.load %arg7[%c2, %c0_17] : memref<18x64xf32, #tpu.memory_space<vmem>>, vector<16x64xf32>
    %17 = arith.truncf %16 : vector<16x64xf32> to vector<16x64xbf16>
    %c2_18 = arith.constant 2 : index
    %c0_19 = arith.constant 0 : index
    %c0_20 = arith.constant 0 : index
    %18 = vector.load %arg2[%c2_18, %c0_19, %c0_20] : memref<3x64x128xbf16, #tpu.memory_space<vmem>>, vector<1x64x128xbf16>
    %19 = vector.shape_cast %18 : vector<1x64x128xbf16> to vector<64x128xbf16>
    %cst_21 = arith.constant dense<0.000000e+00> : vector<16x128xf32>
    %20 = tpu.matmul %17, %19, %cst_21 {dimension_numbers = #tpu.dot_dimension_numbers<[1], [0], [0], [1], [0, 0, 1, 1], [], []>} : vector<16x64xbf16>, vector<64x128xbf16>, vector<16x128xf32> -> vector<16x128xf32>
    %21 = arith.addf %15, %20 : vector<16x128xf32>
    %c0_22 = arith.constant 0 : index
    %c0_23 = arith.constant 0 : index
    %22 = vector.load %arg3[%c0_22, %c0_23] : memref<1x128xf32, #tpu.memory_space<vmem>>, vector<1x128xf32>
    %23 = vector.broadcast %22 : vector<1x128xf32> to vector<16x128xf32>
    %24 = arith.addf %21, %23 : vector<16x128xf32>
    %cst_24 = arith.constant 0.000000e+00 : f32
    %25 = vector.broadcast %cst_24 : f32 to vector<16x128xf32>
    %26 = arith.maximumf %24, %25 : vector<16x128xf32>
    %cst_25 = arith.constant 0.000000e+00 : f32
    %27 = vector.broadcast %cst_25 : f32 to vector<18x128xf32>
    %c0_26 = arith.constant 0 : index
    %c0_27 = arith.constant 0 : index
    %28 = vector.load %arg8[%c0_26, %c0_27] : memref<18x128xf32, #tpu.memory_space<vmem>>, vector<18x128xf32>
    tpu.vector_store %arg8[%c0_26, %c0_27], %27 {strides = array<i32>} : memref<18x128xf32, #tpu.memory_space<vmem>>, vector<18x128xf32>,
    %c1_28 = arith.constant 1 : index
    %c0_29 = arith.constant 0 : index
    %29 = vector.load %arg8[%c1_28, %c0_29] : memref<18x128xf32, #tpu.memory_space<vmem>>, vector<16x128xf32>
    tpu.vector_store %arg8[%c1_28, %c0_29], %26 {strides = array<i32>} : memref<18x128xf32, #tpu.memory_space<vmem>>, vector<16x128xf32>,
    %c0_30 = arith.constant 0 : index
    %c0_31 = arith.constant 0 : index
    %30 = vector.load %arg8[%c0_30, %c0_31] : memref<18x128xf32, #tpu.memory_space<vmem>>, vector<16x128xf32>
    %31 = arith.truncf %30 : vector<16x128xf32> to vector<16x128xbf16>
    %c0_32 = arith.constant 0 : index
    %c0_33 = arith.constant 0 : index
    %c0_34 = arith.constant 0 : index
    %c0_35 = arith.constant 0 : index
    %32 = vector.load %arg4[%c0_32, %c0_33, %c0_34, %c0_35] : memref<2x2x128x128xbf16, #tpu.memory_space<vmem>>, vector<1x1x128x128xbf16>
    %33 = vector.shape_cast %32 : vector<1x1x128x128xbf16> to vector<128x128xbf16>
    %cst_36 = arith.constant dense<0.000000e+00> : vector<16x128xf32>
    %34 = tpu.matmul %31, %33, %cst_36 {dimension_numbers = #tpu.dot_dimension_numbers<[1], [0], [0], [1], [0, 0, 1, 1], [], []>} : vector<16x128xbf16>, vector<128x128xbf16>, vector<16x128xf32> -> vector<16x128xf32>
    %c1_37 = arith.constant 1 : index
    %c0_38 = arith.constant 0 : index
    %35 = vector.load %arg8[%c1_37, %c0_38] : memref<18x128xf32, #tpu.memory_space<vmem>>, vector<16x128xf32>
    %36 = arith.truncf %35 : vector<16x128xf32> to vector<16x128xbf16>
    %c0_39 = arith.constant 0 : index
    %c1_40 = arith.constant 1 : index
    %c0_41 = arith.constant 0 : index
    %c0_42 = arith.constant 0 : index
    %37 = vector.load %arg4[%c0_39, %c1_40, %c0_41, %c0_42] : memref<2x2x128x128xbf16, #tpu.memory_space<vmem>>, vector<1x1x128x128xbf16>
    %38 = vector.shape_cast %37 : vector<1x1x128x128xbf16> to vector<128x128xbf16>
    %cst_43 = arith.constant dense<0.000000e+00> : vector<16x128xf32>
    %39 = tpu.matmul %36, %38, %cst_43 {dimension_numbers = #tpu.dot_dimension_numbers<[1], [0], [0], [1], [0, 0, 1, 1], [], []>} : vector<16x128xbf16>, vector<128x128xbf16>, vector<16x128xf32> -> vector<16x128xf32>
    %40 = arith.addf %34, %39 : vector<16x128xf32>
    %c0_44 = arith.constant 0 : index
    %c0_45 = arith.constant 0 : index
    %41 = vector.load %arg5[%c0_44, %c0_45] : memref<1x128xf32, #tpu.memory_space<vmem>>, vector<1x128xf32>
    %42 = vector.broadcast %41 : vector<1x128xf32> to vector<16x128xf32>
    %43 = arith.addf %40, %42 : vector<16x128xf32>
    %cst_46 = arith.constant 0.000000e+00 : f32
    %44 = vector.broadcast %cst_46 : f32 to vector<16x128xf32>
    %45 = arith.maximumf %43, %44 : vector<16x128xf32>
    %c0_47 = arith.constant 0 : index
    %c0_48 = arith.constant 0 : index
    %c0_49 = arith.constant 0 : index
    %c0_50 = arith.constant 0 : index
    %46 = vector.load %arg6[%c0_47, %c0_48, %c0_49, %c0_50] : memref<1x2x16x128xf32, #tpu.memory_space<vmem>>, vector<1x1x16x128xf32>
    %47 = vector.shape_cast %46 : vector<1x1x16x128xf32> to vector<16x128xf32>
    %48 = vector.shape_cast %45 : vector<16x128xf32> to vector<1x1x16x128xf32>
    tpu.vector_store %arg6[%c0_47, %c0_48, %c0_49, %c0_50], %48 {strides = array<i32>} : memref<1x2x16x128xf32, #tpu.memory_space<vmem>>, vector<1x1x16x128xf32>,
    %c1_51 = arith.constant 1 : index
    %c0_52 = arith.constant 0 : index
    %49 = vector.load %arg8[%c1_51, %c0_52] : memref<18x128xf32, #tpu.memory_space<vmem>>, vector<16x128xf32>
    %50 = arith.truncf %49 : vector<16x128xf32> to vector<16x128xbf16>
    %c1_53 = arith.constant 1 : index
    %c0_54 = arith.constant 0 : index
    %c0_55 = arith.constant 0 : index
    %c0_56 = arith.constant 0 : index
    %51 = vector.load %arg4[%c1_53, %c0_54, %c0_55, %c0_56] : memref<2x2x128x128xbf16, #tpu.memory_space<vmem>>, vector<1x1x128x128xbf16>
    %52 = vector.shape_cast %51 : vector<1x1x128x128xbf16> to vector<128x128xbf16>
    %cst_57 = arith.constant dense<0.000000e+00> : vector<16x128xf32>
    %53 = tpu.matmul %50, %52, %cst_57 {dimension_numbers = #tpu.dot_dimension_numbers<[1], [0], [0], [1], [0, 0, 1, 1], [], []>} : vector<16x128xbf16>, vector<128x128xbf16>, vector<16x128xf32> -> vector<16x128xf32>
    %c2_58 = arith.constant 2 : index
    %c0_59 = arith.constant 0 : index
    %54 = vector.load %arg8[%c2_58, %c0_59] : memref<18x128xf32, #tpu.memory_space<vmem>>, vector<16x128xf32>
    %55 = arith.truncf %54 : vector<16x128xf32> to vector<16x128xbf16>
    %c1_60 = arith.constant 1 : index
    %c1_61 = arith.constant 1 : index
    %c0_62 = arith.constant 0 : index
    %c0_63 = arith.constant 0 : index
    %56 = vector.load %arg4[%c1_60, %c1_61, %c0_62, %c0_63] : memref<2x2x128x128xbf16, #tpu.memory_space<vmem>>, vector<1x1x128x128xbf16>
    %57 = vector.shape_cast %56 : vector<1x1x128x128xbf16> to vector<128x128xbf16>
    %cst_64 = arith.constant dense<0.000000e+00> : vector<16x128xf32>
    %58 = tpu.matmul %55, %57, %cst_64 {dimension_numbers = #tpu.dot_dimension_numbers<[1], [0], [0], [1], [0, 0, 1, 1], [], []>} : vector<16x128xbf16>, vector<128x128xbf16>, vector<16x128xf32> -> vector<16x128xf32>
    %59 = arith.addf %53, %58 : vector<16x128xf32>
    %c0_65 = arith.constant 0 : index
    %c0_66 = arith.constant 0 : index
    %60 = vector.load %arg5[%c0_65, %c0_66] : memref<1x128xf32, #tpu.memory_space<vmem>>, vector<1x128xf32>
    %61 = vector.broadcast %60 : vector<1x128xf32> to vector<16x128xf32>
    %62 = arith.addf %59, %61 : vector<16x128xf32>
    %cst_67 = arith.constant 0.000000e+00 : f32
    %63 = vector.broadcast %cst_67 : f32 to vector<16x128xf32>
    %64 = arith.maximumf %62, %63 : vector<16x128xf32>
    %c0_68 = arith.constant 0 : index
    %c1_69 = arith.constant 1 : index
    %c0_70 = arith.constant 0 : index
    %c0_71 = arith.constant 0 : index
    %65 = vector.load %arg6[%c0_68, %c1_69, %c0_70, %c0_71] : memref<1x2x16x128xf32, #tpu.memory_space<vmem>>, vector<1x1x16x128xf32>
    %66 = vector.shape_cast %65 : vector<1x1x16x128xf32> to vector<16x128xf32>
    %67 = vector.shape_cast %64 : vector<16x128xf32> to vector<1x1x16x128xf32>
    tpu.vector_store %arg6[%c0_68, %c1_69, %c0_70, %c0_71], %67 {strides = array<i32>} : memref<1x2x16x128xf32, #tpu.memory_space<vmem>>, vector<1x1x16x128xf32>,
    return
  }
  func.func @transform_0(%arg0: i32) -> (i32, i32, i32) {
    %c0_i32 = arith.constant 0 : i32
    %c0_i32_0 = arith.constant 0 : i32
    %c0_i32_1 = arith.constant 0 : i32
    return %arg0, %c0_i32, %c0_i32_0 : i32, i32, i32
  }
  func.func @transform_1(%arg0: i32) -> (i32, i32, i32) {
    %c0_i32 = arith.constant 0 : i32
    %c0_i32_0 = arith.constant 0 : i32
    %c0_i32_1 = arith.constant 0 : i32
    %c0_i32_2 = arith.constant 0 : i32
    return %c0_i32, %c0_i32_0, %c0_i32_1 : i32, i32, i32
  }
  func.func @transform_2(%arg0: i32) -> (i32, i32) {
    %c0_i32 = arith.constant 0 : i32
    %c0_i32_0 = arith.constant 0 : i32
    %c0_i32_1 = arith.constant 0 : i32
    return %c0_i32, %c0_i32_0 : i32, i32
  }
  func.func @transform_3(%arg0: i32) -> (i32, i32, i32, i32) {
    %c0_i32 = arith.constant 0 : i32
    %c0_i32_0 = arith.constant 0 : i32
    %c0_i32_1 = arith.constant 0 : i32
    %c0_i32_2 = arith.constant 0 : i32
    %c0_i32_3 = arith.constant 0 : i32
    return %c0_i32, %c0_i32_0, %c0_i32_1, %c0_i32_2 : i32, i32, i32, i32
  }
  func.func @transform_4(%arg0: i32) -> (i32, i32) {
    %c0_i32 = arith.constant 0 : i32
    %c0_i32_0 = arith.constant 0 : i32
    %c0_i32_1 = arith.constant 0 : i32
    return %c0_i32, %c0_i32_0 : i32, i32
  }
  func.func @transform_5(%arg0: i32) -> (i32, i32, i32, i32) {
    %c0_i32 = arith.constant 0 : i32
    %c0_i32_0 = arith.constant 0 : i32
    %c0_i32_1 = arith.constant 0 : i32
    %c0_i32_2 = arith.constant 0 : i32
    return %arg0, %c0_i32, %c0_i32_0, %c0_i32_1 : i32, i32, i32, i32
  }
}

</mosaic_0001>

<bundles_post_ra>
// kernel: tile.18
= control target key start
LH: loop header
LB: loop body
LE: loop exit
PB: predicated region body
PF: predicated region fallthrough
CT: control target
= control target key end

     0   :  { %s40_s0 = inlined_call_operand.vmem [shape: f32[4], index: 0, kind: input, shape index: {}]   ;;  %s41_s1 = inlined_call_operand.vmem [shape: f32[32,4], index: 1, kind: output, shape index: {}]  }
   0x1   :  { %v4_v0 = vld [vmem:[%s40_s0] ss:$0 sm:$0xff] }
   0x2   :  { %5 = vst [vmem:[%s41_s1] sm:$0xff] %v4_v0  ;;  %12 = vst [vmem:[%s41_s1 + $0x8] sm:$0xff] %v4_v0 }
   0x3   :  { %13 = vst [vmem:[%s41_s1 + $0x10] sm:$0xff] %v4_v0  ;;  %14 = vst [vmem:[%s41_s1 + $0x18] sm:$0xff] %v4_v0 }

// kernel: tile.19
= control target key start
LH: loop header
LB: loop body
LE: loop exit
PB: predicated region body
PF: predicated region fallthrough
CT: control target
= control target key end

     0   :  { %s259_s10 = smov 124   ;;  %s260_s11 = smov 116   ;;  %vm3_vm0 = vcmask 31744   ;;  %vm9_vm1 = vcmask 1048544   ;;  %vm15_vm2 = vcmask 1015744   ;;  %vm21_vm3 = vcmask 982944   ;;  %s399_s0 = inlined_call_operand.vmem [shape: f32[32,4], index: 0, kind: input, shape index: {}]   ;;  %s400_s1 = inlined_call_operand.vmem [shape: f32[1,128], index: 1, kind: output, shape index: {}]  }
   0x1   :  { %v197_v0 = vld [vmem:[%s399_s0 + $0x1f] sm:$0x1]   ;;  %v199_v1 = vld [vmem:[%s399_s0 + $0x1d] sm:$0x1]   ;;  %v198_v2 = vld [vmem:[%s399_s0 + $0x1e] sm:$0x1]  }
   0x2   :  { %7 = vrot.lane.b32.xlu0 %v197_v0, %s259_s10  ;;  %19 = vrot.lane.b32.xlu1 %v199_v1, %s260_s11  ;;  %v200_v3 = vld [vmem:[%s399_s0 + $0x1c] sm:$0x1]   ;;  %s261_s16 = smov 120   ;;  %s262_s17 = smov 112   ;;  %v201_v4 = vld [vmem:[%s399_s0 + $0x1b] sm:$0x1]  }
   0x3   :  { %v202_v5 = vld [vmem:[%s399_s0 + $0x1a] sm:$0x1]   ;;  %s263_s22 = smov 108   ;;  %s264_s23 = smov 104   ;;  %v203_v6 = vld [vmem:[%s399_s0 + $0x19] sm:$0x1]  }
   0x4   :  { %v204_v7 = vld [vmem:[%s399_s0 + $0x18] sm:$0x1]   ;;  %s265_s28 = smov 100   ;;  %s266_s29 = smov 96   ;;  %v205_v8 = vld [vmem:[%s399_s0 + $0x17] sm:$0x1]  }
   0x5   :  { %v206_v9 = vld [vmem:[%s399_s0 + $0x16] sm:$0x1]   ;;  %v2_v10 = vld [vmem:[%s399_s0] sm:$0x1]   ;;  %s267_s7 = smov 92   ;;  %s268_s8 = smov 88  }
   0x6   :  { %13 = vrot.lane.b32.xlu0 %v198_v2, %s261_s16  ;;  %25 = vrot.lane.b32.xlu1 %v200_v3, %s262_s17  ;;  %4 = vst.msk [vmem:[#allocation0] sm:$0x1] %vm3_vm0, %v2_v10   ;;  %v207_v11 = vld [vmem:[%s399_s0 + $0x15] sm:$0x1]   ;;  %v208_v12 = vld [vmem:[%s399_s0 + $0x14] sm:$0x1]  }
   0x7   :  { %s269_s13 = smov 84   ;;  %s270_s14 = smov 80   ;;  %v209_v13 = vld [vmem:[%s399_s0 + $0x13] sm:$0x1]   ;;  %v210_v14 = vld [vmem:[%s399_s0 + $0x12] sm:$0x1]  }
   0x8   :  { %s271_s19 = smov 76   ;;  %s272_s20 = smov 72   ;;  %v211_v15 = vld [vmem:[%s399_s0 + $0x11] sm:$0x1]   ;;  %v212_v16 = vld [vmem:[%s399_s0 + $0x10] sm:$0x1]  }
   0x9   :  { %s273_s25 = smov 68   ;;  %s274_s26 = smov 64   ;;  %v213_v17 = vld [vmem:[%s399_s0 + $0xf] sm:$0x1]   ;;  %v214_v18 = vld [vmem:[%s399_s0 + $0xe] sm:$0x1]  }
   0xa   :  { %31 = vrot.lane.b32.xlu0 %v201_v4, %s263_s22  ;;  %37 = vrot.lane.b32.xlu1 %v202_v5, %s264_s23  ;;  %s275_s2 = smov 60   ;;  %s276_s3 = smov 56   ;;  %v215_v19 = vld [vmem:[%s399_s0 + $0xd] sm:$0x1]   ;;  %v216_v20 = vld [vmem:[%s399_s0 + $0xc] sm:$0x1]  }
   0xb   :  { %s278_s9 = smov 48   ;;  %v217_v21 = vld [vmem:[%s399_s0 + $0xb] sm:$0x1]   ;;  %v218_v22 = vld [vmem:[%s399_s0 + $0xa] sm:$0x1]   ;;  %s280_s15 = smov 40  }
   0xc   :  { %v219_v23 = vld [vmem:[%s399_s0 + $0x9] sm:$0x1]   ;;  %v220_v24 = vld [vmem:[%s399_s0 + $0x8] sm:$0x1]   ;;  %s282_s21 = smov 32   ;;  %s284_s27 = smov 24  }
   0xd   :  { %v221_v25 = vld [vmem:[%s399_s0 + $0x7] sm:$0x1]   ;;  %v222_v26 = vld [vmem:[%s399_s0 + $0x6] sm:$0x1]   ;;  %v223_v27 = vld [vmem:[%s399_s0 + $0x5] sm:$0x1]  }
   0xe   :  { %43 = vrot.lane.b32.xlu0 %v203_v6, %s265_s28  ;;  %49 = vrot.lane.b32.xlu1 %v204_v7, %s266_s29  ;;  %v224_v28 = vld [vmem:[%s399_s0 + $0x4] sm:$0x1]   ;;  %s286_s4 = smov 16   ;;  %v225_v29 = vld [vmem:[%s399_s0 + $0x3] sm:$0x1]   ;;  %s288_s10 = smov 8  }
   0xf   :  { %v226_v30 = vld [vmem:[%s399_s0 + $0x2] sm:$0x1]   ;;  %v227_v31 = vld [vmem:[%s399_s0 + $0x1] sm:$0x1]   ;;  %s289_s0 = smov 4   ;;  %vm27_vm4 = vcmask 950144  }
  0x10   :  { %vm33_vm5 = vcmask 917344   ;;  %vm39_vm6 = vcmask 884544   ;;  %vm45_vm7 = vcmask 851744   ;;  %vm51_vm8 = vcmask 818944  }
  0x11   :  { %vm57_vm9 = vcmask 786144   ;;  %vm63_vm10 = vcmask 753344   ;;  %vm69_vm11 = vcmask 720544   ;;  %vm75_vm12 = vcmask 687744  }
  0x12   :  { %55 = vrot.lane.b32.xlu0 %v205_v8, %s267_s7  ;;  %61 = vrot.lane.b32.xlu1 %v206_v9, %s268_s8  ;;  %s277_s8 = smov 52   ;;  %vm81_vm13 = vcmask 654944   ;;  %vm87_vm14 = vcmask 622144   ;;  %vm93_vm15 = vcmask 589344   ;;  %vm99_vm0 = vcmask 556544  }
  0x16   :  { %67 = vrot.lane.b32.xlu0 %v207_v11, %s269_s13  ;;  %73 = vrot.lane.b32.xlu1 %v208_v12, %s270_s14  ;;  %s279_s14 = smov 44  }
  0x1a   :  { %79 = vrot.lane.b32.xlu0 %v209_v13, %s271_s19  ;;  %85 = vrot.lane.b32.xlu1 %v210_v14, %s272_s20  ;;  %s281_s20 = smov 36  }
  0x1e   :  { %91 = vrot.lane.b32.xlu0 %v211_v15, %s273_s25  ;;  %97 = vrot.lane.b32.xlu1 %v212_v16, %s274_s26  ;;  %s283_s26 = smov 28  }
  0x22   :  { %103 = vrot.lane.b32.xlu0 %v213_v17, %s275_s2  ;;  %109 = vrot.lane.b32.xlu1 %v214_v18, %s276_s3  ;;  %s285_s3 = smov 20  }
  0x26   :  { %115 = vrot.lane.b32.xlu0 %v215_v19, %s277_s8  ;;  %121 = vrot.lane.b32.xlu1 %v216_v20, %s278_s9  ;;  %s287_s9 = smov 12  }
  0x2a   :  { %127 = vrot.lane.b32.xlu0 %v217_v21, %s279_s14  ;;  %133 = vrot.lane.b32.xlu1 %v218_v22, %s280_s15 }
  0x2e   :  { %139 = vrot.lane.b32.xlu0 %v219_v23, %s281_s20  ;;  %145 = vrot.lane.b32.xlu1 %v220_v24, %s282_s21 }
  0x32   :  { %151 = vrot.lane.b32.xlu0 %v221_v25, %s283_s26  ;;  %157 = vrot.lane.b32.xlu1 %v222_v26, %s284_s27 }
  0x36   :  { %163 = vrot.lane.b32.xlu0 %v223_v27, %s285_s3  ;;  %169 = vrot.lane.b32.xlu1 %v224_v28, %s286_s4 }
  0x3a   :  { %175 = vrot.lane.b32.xlu0 %v225_v29, %s287_s9  ;;  %181 = vrot.lane.b32.xlu1 %v226_v30, %s288_s10 }
  0x3e   :  { %187 = vrot.lane.b32.xlu0 %v227_v31, %s289_s0 }
  0x74   :  { %v8_v32 = vpop.permute.xlu0 %7   ;;  %v20_v33 = vpop.permute.xlu1 %19  }
  0x75   :  { %10 = vst.msk [vmem:[#allocation0] sm:$0x1] %vm9_vm1, %v8_v32   ;;  %vm105_vm1 = vcmask 523744  }
  0x78   :  { %v14_v34 = vpop.permute.xlu0 %13   ;;  %v26_v35 = vpop.permute.xlu1 %25  }
  0x79   :  { %16 = vst.msk [vmem:[#allocation0] sm:$0x1] %vm15_vm2, %v14_v34   ;;  %vm111_vm2 = vcmask 490944  }
  0x7a   :  { %22 = vst.msk [vmem:[#allocation0] sm:$0x1] %vm21_vm3, %v20_v33   ;;  %vm117_vm3 = vcmask 458144  }
  0x7b   :  { %28 = vst.msk [vmem:[#allocation0] sm:$0x1] %vm27_vm4, %v26_v35   ;;  %vm123_vm4 = vcmask 425344  }
  0x7c   :  { %v32_v36 = vpop.permute.xlu0 %31   ;;  %v38_v37 = vpop.permute.xlu1 %37  }
  0x7d   :  { %34 = vst.msk [vmem:[#allocation0] sm:$0x1] %vm33_vm5, %v32_v36   ;;  %vm129_vm5 = vcmask 392544  }
  0x7e   :  { %40 = vst.msk [vmem:[#allocation0] sm:$0x1] %vm39_vm6, %v38_v37   ;;  %vm135_vm6 = vcmask 359744  }
  0x80   :  { %v44_v38 = vpop.permute.xlu0 %43   ;;  %v50_v39 = vpop.permute.xlu1 %49  }
  0x81   :  { %46 = vst.msk [vmem:[#allocation0] sm:$0x1] %vm45_vm7, %v44_v38   ;;  %vm141_vm7 = vcmask 326944  }
  0x82   :  { %52 = vst.msk [vmem:[#allocation0] sm:$0x1] %vm51_vm8, %v50_v39   ;;  %vm147_vm8 = vcmask 294144  }
  0x84   :  { %v56_v40 = vpop.permute.xlu0 %55   ;;  %v62_v41 = vpop.permute.xlu1 %61  }
  0x85   :  { %58 = vst.msk [vmem:[#allocation0] sm:$0x1] %vm57_vm9, %v56_v40   ;;  %vm153_vm9 = vcmask 261344  }
  0x86   :  { %64 = vst.msk [vmem:[#allocation0] sm:$0x1] %vm63_vm10, %v62_v41   ;;  %vm159_vm10 = vcmask 228544  }
  0x88   :  { %v68_v42 = vpop.permute.xlu0 %67   ;;  %v74_v43 = vpop.permute.xlu1 %73  }
  0x89   :  { %70 = vst.msk [vmem:[#allocation0] sm:$0x1] %vm69_vm11, %v68_v42   ;;  %vm165_vm11 = vcmask 195744  }
  0x8a   :  { %76 = vst.msk [vmem:[#allocation0] sm:$0x1] %vm75_vm12, %v74_v43   ;;  %vm171_vm12 = vcmask 162944  }
  0x8c   :  { %v80_v44 = vpop.permute.xlu0 %79   ;;  %v86_v45 = vpop.permute.xlu1 %85  }
  0x8d   :  { %82 = vst.msk [vmem:[#allocation0] sm:$0x1] %vm81_vm13, %v80_v44   ;;  %vm177_vm13 = vcmask 130144  }
  0x8e   :  { %88 = vst.msk [vmem:[#allocation0] sm:$0x1] %vm87_vm14, %v86_v45   ;;  %vm183_vm14 = vcmask 97344  }
  0x90   :  { %v92_v46 = vpop.permute.xlu0 %91   ;;  %v98_v47 = vpop.permute.xlu1 %97  }
  0x91   :  { %94 = vst.msk [vmem:[#allocation0] sm:$0x1] %vm93_vm15, %v92_v46   ;;  %vm189_vm15 = vcmask 64544  }
  0x92   :  { %100 = vst.msk [vmem:[#allocation0] sm:$0x1] %vm99_vm0, %v98_v47  }
  0x94   :  { %v104_v48 = vpop.permute.xlu0 %103   ;;  %v110_v49 = vpop.permute.xlu1 %109  }
  0x95   :  { %106 = vst.msk [vmem:[#allocation0] sm:$0x1] %vm105_vm1, %v104_v48  }
  0x96   :  { %112 = vst.msk [vmem:[#allocation0] sm:$0x1] %vm111_vm2, %v110_v49  }
  0x98   :  { %v116_v50 = vpop.permute.xlu0 %115   ;;  %v122_v51 = vpop.permute.xlu1 %121  }
  0x99   :  { %118 = vst.msk [vmem:[#allocation0] sm:$0x1] %vm117_vm3, %v116_v50  }
  0x9a   :  { %124 = vst.msk [vmem:[#allocation0] sm:$0x1] %vm123_vm4, %v122_v51  }
  0x9c   :  { %v128_v52 = vpop.permute.xlu0 %127   ;;  %v134_v53 = vpop.permute.xlu1 %133  }
  0x9d   :  { %130 = vst.msk [vmem:[#allocation0] sm:$0x1] %vm129_vm5, %v128_v52  }
  0x9e   :  { %136 = vst.msk [vmem:[#allocation0] sm:$0x1] %vm135_vm6, %v134_v53  }
  0xa0   :  { %v140_v54 = vpop.permute.xlu0 %139   ;;  %v146_v55 = vpop.permute.xlu1 %145  }
  0xa1   :  { %142 = vst.msk [vmem:[#allocation0] sm:$0x1] %vm141_vm7, %v140_v54  }
  0xa2   :  { %148 = vst.msk [vmem:[#allocation0] sm:$0x1] %vm147_vm8, %v146_v55  }
  0xa4   :  { %v152_v56 = vpop.permute.xlu0 %151   ;;  %v158_v57 = vpop.permute.xlu1 %157  }
  0xa5   :  { %154 = vst.msk [vmem:[#allocation0] sm:$0x1] %vm153_vm9, %v152_v56  }
  0xa6   :  { %160 = vst.msk [vmem:[#allocation0] sm:$0x1] %vm159_vm10, %v158_v57  }
  0xa8   :  { %v164_v58 = vpop.permute.xlu0 %163   ;;  %v170_v59 = vpop.permute.xlu1 %169  }
  0xa9   :  { %166 = vst.msk [vmem:[#allocation0] sm:$0x1] %vm165_vm11, %v164_v58  }
  0xaa   :  { %172 = vst.msk [vmem:[#allocation0] sm:$0x1] %vm171_vm12, %v170_v59  }
  0xac   :  { %v176_v60 = vpop.permute.xlu0 %175   ;;  %v182_v61 = vpop.permute.xlu1 %181  }
  0xad   :  { %178 = vst.msk [vmem:[#allocation0] sm:$0x1] %vm177_vm13, %v176_v60  }
  0xae   :  { %184 = vst.msk [vmem:[#allocation0] sm:$0x1] %vm183_vm14, %v182_v61  }
  0xb0   :  { %v188_v62 = vpop.permute.xlu0 %187  }
  0xb1   :  { %190 = vst.msk [vmem:[#allocation0] sm:$0x1] %vm189_vm15, %v188_v62  }
  0xb8   :  { %v194_v63 = vld [vmem:[#allocation0] sm:$0x1] }
  0xb9   :  { %196 = vst [vmem:[%s400_s1] sm:$0x1] %v194_v63 }

// kernel: tile.13
= control target key start
LH: loop header
LB: loop body
LE: loop exit
PB: predicated region body
PF: predicated region fallthrough
CT: control target
= control target key end

     0   :  { %s28_s0 = inlined_call_operand.vmem [shape: f32[8], index: 0, kind: input, shape index: {}]   ;;  %s29_s1 = inlined_call_operand.vmem [shape: f32[16,8], index: 1, kind: output, shape index: {}]  }
   0x1   :  { %v4_v0 = vld [vmem:[%s28_s0] ss:$0 sm:$0xff] }
   0x2   :  { %5 = vst [vmem:[%s29_s1] sm:$0xff] %v4_v0  ;;  %8 = vst [vmem:[%s29_s1 + $0x8] sm:$0xff] %v4_v0 }

// kernel: tile.14
= control target key start
LH: loop header
LB: loop body
LE: loop exit
PB: predicated region body
PF: predicated region fallthrough
CT: control target
= control target key end

     0   :  { %s131_s10 = smov 120   ;;  %s132_s11 = smov 104   ;;  %vm3_vm0 = vcmask 64512   ;;  %vm9_vm1 = vcmask 1048512   ;;  %vm15_vm2 = vcmask 982912   ;;  %vm21_vm3 = vcmask 917312   ;;  %s207_s0 = inlined_call_operand.vmem [shape: f32[16,8], index: 0, kind: input, shape index: {}]   ;;  %s208_s1 = inlined_call_operand.vmem [shape: f32[1,128], index: 1, kind: output, shape index: {}]  }
   0x1   :  { %v101_v0 = vld [vmem:[%s207_s0 + $0xf] sm:$0x1]   ;;  %v103_v1 = vld [vmem:[%s207_s0 + $0xd] sm:$0x1]   ;;  %v102_v2 = vld [vmem:[%s207_s0 + $0xe] sm:$0x1]  }
   0x2   :  { %7 = vrot.lane.b32.xlu0 %v101_v0, %s131_s10  ;;  %19 = vrot.lane.b32.xlu1 %v103_v1, %s132_s11  ;;  %v104_v3 = vld [vmem:[%s207_s0 + $0xc] sm:$0x1]   ;;  %s133_s16 = smov 112   ;;  %s134_s17 = smov 96   ;;  %v105_v4 = vld [vmem:[%s207_s0 + $0xb] sm:$0x1]  }
   0x3   :  { %v106_v5 = vld [vmem:[%s207_s0 + $0xa] sm:$0x1]   ;;  %v2_v6 = vld [vmem:[%s207_s0] sm:$0x1]   ;;  %s135_s24 = smov 88   ;;  %s136_s25 = smov 80  }
   0x4   :  { %4 = vst.msk [vmem:[#allocation0] sm:$0x1] %vm3_vm0, %v2_v6   ;;  %v107_v7 = vld [vmem:[%s207_s0 + $0x9] sm:$0x1]   ;;  %v108_v8 = vld [vmem:[%s207_s0 + $0x8] sm:$0x1]  }
   0x5   :  { %s137_s30 = smov 72   ;;  %s138_s2 = smov 64   ;;  %v109_v9 = vld [vmem:[%s207_s0 + $0x7] sm:$0x1]   ;;  %v110_v10 = vld [vmem:[%s207_s0 + $0x6] sm:$0x1]  }
   0x6   :  { %13 = vrot.lane.b32.xlu0 %v102_v2, %s133_s16  ;;  %25 = vrot.lane.b32.xlu1 %v104_v3, %s134_s17  ;;  %s139_s7 = smov 56   ;;  %s140_s8 = smov 48   ;;  %v111_v11 = vld [vmem:[%s207_s0 + $0x5] sm:$0x1]   ;;  %v112_v12 = vld [vmem:[%s207_s0 + $0x4] sm:$0x1]  }
   0x7   :  { %s141_s13 = smov 40   ;;  %s142_s14 = smov 32   ;;  %v113_v13 = vld [vmem:[%s207_s0 + $0x3] sm:$0x1]   ;;  %v114_v14 = vld [vmem:[%s207_s0 + $0x2] sm:$0x1]  }
   0x8   :  { %s143_s19 = smov 24   ;;  %s144_s20 = smov 16   ;;  %v115_v15 = vld [vmem:[%s207_s0 + $0x1] sm:$0x1]   ;;  %vm27_vm4 = vcmask 851712   ;;  %vm33_vm5 = vcmask 786112  }
   0x9   :  { %s145_s0 = smov 8   ;;  %vm39_vm6 = vcmask 720512   ;;  %vm45_vm7 = vcmask 654912   ;;  %vm51_vm8 = vcmask 589312   ;;  %vm57_vm9 = vcmask 523712  }
   0xa   :  { %31 = vrot.lane.b32.xlu0 %v105_v4, %s135_s24  ;;  %37 = vrot.lane.b32.xlu1 %v106_v5, %s136_s25  ;;  %vm63_vm10 = vcmask 458112   ;;  %vm69_vm11 = vcmask 392512   ;;  %vm75_vm12 = vcmask 326912   ;;  %vm81_vm13 = vcmask 261312  }
   0xb   :  { %vm87_vm14 = vcmask 195712   ;;  %vm93_vm15 = vcmask 130112  }
   0xe   :  { %43 = vrot.lane.b32.xlu0 %v107_v7, %s137_s30  ;;  %49 = vrot.lane.b32.xlu1 %v108_v8, %s138_s2 }
  0x12   :  { %55 = vrot.lane.b32.xlu0 %v109_v9, %s139_s7  ;;  %61 = vrot.lane.b32.xlu1 %v110_v10, %s140_s8 }
  0x16   :  { %67 = vrot.lane.b32.xlu0 %v111_v11, %s141_s13  ;;  %73 = vrot.lane.b32.xlu1 %v112_v12, %s142_s14 }
  0x1a   :  { %79 = vrot.lane.b32.xlu0 %v113_v13, %s143_s19  ;;  %85 = vrot.lane.b32.xlu1 %v114_v14, %s144_s20 }
  0x1e   :  { %91 = vrot.lane.b32.xlu0 %v115_v15, %s145_s0 }
  0x74   :  { %v8_v16 = vpop.permute.xlu0 %7   ;;  %v20_v17 = vpop.permute.xlu1 %19  }
  0x75   :  { %10 = vst.msk [vmem:[#allocation0] sm:$0x1] %vm9_vm1, %v8_v16  }
  0x78   :  { %v14_v18 = vpop.permute.xlu0 %13   ;;  %v26_v19 = vpop.permute.xlu1 %25  }
  0x79   :  { %16 = vst.msk [vmem:[#allocation0] sm:$0x1] %vm15_vm2, %v14_v18  }
  0x7a   :  { %22 = vst.msk [vmem:[#allocation0] sm:$0x1] %vm21_vm3, %v20_v17  }
  0x7b   :  { %28 = vst.msk [vmem:[#allocation0] sm:$0x1] %vm27_vm4, %v26_v19  }
  0x7c   :  { %v32_v20 = vpop.permute.xlu0 %31   ;;  %v38_v21 = vpop.permute.xlu1 %37  }
  0x7d   :  { %34 = vst.msk [vmem:[#allocation0] sm:$0x1] %vm33_vm5, %v32_v20  }
  0x7e   :  { %40 = vst.msk [vmem:[#allocation0] sm:$0x1] %vm39_vm6, %v38_v21  }
  0x80   :  { %v44_v22 = vpop.permute.xlu0 %43   ;;  %v50_v23 = vpop.permute.xlu1 %49  }
  0x81   :  { %46 = vst.msk [vmem:[#allocation0] sm:$0x1] %vm45_vm7, %v44_v22  }
  0x82   :  { %52 = vst.msk [vmem:[#allocation0] sm:$0x1] %vm51_vm8, %v50_v23  }
  0x84   :  { %v56_v24 = vpop.permute.xlu0 %55   ;;  %v62_v25 = vpop.permute.xlu1 %61  }
  0x85   :  { %58 = vst.msk [vmem:[#allocation0] sm:$0x1] %vm57_vm9, %v56_v24  }
  0x86   :  { %64 = vst.msk [vmem:[#allocation0] sm:$0x1] %vm63_vm10, %v62_v25  }
  0x88   :  { %v68_v26 = vpop.permute.xlu0 %67   ;;  %v74_v27 = vpop.permute.xlu1 %73  }
  0x89   :  { %70 = vst.msk [vmem:[#allocation0] sm:$0x1] %vm69_vm11, %v68_v26  }
  0x8a   :  { %76 = vst.msk [vmem:[#allocation0] sm:$0x1] %vm75_vm12, %v74_v27  }
  0x8c   :  { %v80_v28 = vpop.permute.xlu0 %79   ;;  %v86_v29 = vpop.permute.xlu1 %85  }
  0x8d   :  { %82 = vst.msk [vmem:[#allocation0] sm:$0x1] %vm81_vm13, %v80_v28  }
  0x8e   :  { %88 = vst.msk [vmem:[#allocation0] sm:$0x1] %vm87_vm14, %v86_v29  }
  0x90   :  { %v92_v30 = vpop.permute.xlu0 %91  }
  0x91   :  { %94 = vst.msk [vmem:[#allocation0] sm:$0x1] %vm93_vm15, %v92_v30  }
  0x98   :  { %v98_v31 = vld [vmem:[#allocation0] sm:$0x1] }
  0x99   :  { %100 = vst [vmem:[%s208_s1] sm:$0x1] %v98_v31 }

// kernel: decoder_block_pallas.1
= control target key start
LH: loop header
LB: loop body
LE: loop exit
PB: predicated region body
PF: predicated region fallthrough
CT: control target
= control target key end

     0   :  { %s1399_s18 = smov 0   ;;  %s1629_s0 = inlined_call_operand.vmem [shape: f32[2,16,64], index: 0, kind: input, shape index: {}]   ;;  %s1630_s1 = inlined_call_operand.vmem [shape: bf16[3,64,128], index: 1, kind: input, shape index: {}]   ;;  %s1631_s2 = inlined_call_operand.vmem [shape: f32[1,128], index: 2, kind: input, shape index: {}]   ;;  %s1632_s3 = inlined_call_operand.vmem [shape: bf16[2,2,128,128], index: 3, kind: input, shape index: {}]   ;;  %s1633_s4 = inlined_call_operand.vmem [shape: f32[1,128], index: 4, kind: input, shape index: {}]   ;;  %s1634_s5 = inlined_call_operand.vmem [shape: f32[2,2,16,128], index: 5, kind: output, shape index: {}]  }
   0x1 LB: > { %s1009_s19 = sadd.s32 4294967295, %s1365_s18   ;;  %p1013_p0 = scmp.ge.s32.totalorder %s1365_s18, 1  ;;  %s1365_s18 = sphi %s1399_s18, %s15_s18  }
   0x2   : > { %p187_p1 = scmp.lt.s32.totalorder %s1365_s18, 3 }
   0x4   : > { %p188_p2 = pnand %p1013_p0, %p187_p1 }
   0x5   : > { %v1315_v0 = vld [vmem:[%s1630_s1 + $0x20] sm:$0xff] (!%p188_p2)   ;;  %v1367_v1 = vmov (!%p188_p2), 0.0   ;;  %v1317_v3 = vld [vmem:[%s1630_s1 + $0x28] sm:$0xff] (!%p188_p2)   ;;  %vm1368_vm0 = vmmov (!%p188_p2), 0   ;;  %p215_p3 = scmp.lt.s32.totalorder (!%p188_p2), %s1009_s19, 1  ;;  %vm226_vm1 = vcmask (!%p188_p2), 523264  }
   0x6   : > { %191 = sbr.rel (%p188_p2) target bundleno = 526 (0x20e), region = 40  ;;  %1189 = vmatprep.subr.bf16.mxu0 (!%p188_p2), %v1367_v1  ;;  %487 = vst [vmem:[#allocation3] sm:$0xff] (!%p188_p2), %v1367_v1  ;;  %488 = vst [vmem:[#allocation3 + $0x8] sm:$0xff] (!%p188_p2), %v1367_v1  ;;  %1201 = vmatprep.subr.bf16.mxu1 (!%p188_p2), %v1367_v1  ;;  %v1316_v2 = vld [vmem:[%s1630_s1] sm:$0xff] (!%p188_p2)   ;;  %v1318_v4 = vld [vmem:[%s1630_s1 + $0x8] sm:$0xff] (!%p188_p2)   ;;  %vm229_vm2 = vcmask (!%p188_p2), 517120  }
   0x7   : > { %489 = vst [vmem:[#allocation3 + $0x10] sm:$0x3] (!%p188_p2), %v1367_v1  ;;  %1190 = vmatpush3.bf16.msra.mxu0 (!%p188_p2), %v1315_v0  ;;  %1197 = vmatprep.mubr.msk.bf16.mxu0 (!%p188_p2), %vm1368_vm0, %v1367_v1  ;;  %227 = vst.msk [vmem:[#allocation2] sm:$0xff] (!%p188_p2), %vm226_vm1, %v1367_v1  ;;  %v1319_v5 = vld [vmem:[%s1630_s1 + $0x30] sm:$0xff] (!%p188_p2)   ;;  %v1321_v9 = vld [vmem:[%s1630_s1 + $0x38] sm:$0xff] (!%p188_p2)  }
   0x8   : > { %1202 = vmatpush3.bf16.msra.mxu1 (!%p188_p2), %v1316_v2  ;;  %1191 = vmatprep.subr.bf16.mxu0 (!%p188_p2), %v1367_v1  ;;  %228 = vst.msk [vmem:[#allocation2 + $0x8] sm:$0xff] (!%p188_p2), %vm226_vm1, %v1367_v1  ;;  %v1320_v6 = vld [vmem:[%s1630_s1 + $0x10] sm:$0xff] (!%p188_p2)   ;;  %v1322_v10 = vld [vmem:[%s1630_s1 + $0x18] sm:$0xff] (!%p188_p2)   ;;  %v1323_v11 = vld [vmem:[%s1630_s1 + $0x40] sm:$0xff] (!%p188_p2)  }
   0x9   : > { %1203 = vmatprep.subr.bf16.mxu1 (!%p188_p2), %v1367_v1  ;;  %1209 = vmatprep.mubr.msk.bf16.mxu1 (!%p188_p2), %vm1368_vm0, %v1367_v1  ;;  %230 = vst.msk [vmem:[#allocation2 + $0x10] sm:$0x3] (!%p188_p2), %vm229_vm2, %v1367_v1  ;;  %v1324_v18 = vld [vmem:[%s1630_s1 + $0x48] sm:$0xff] (!%p188_p2)   ;;  %v1325_v19 = vld [vmem:[%s1630_s1 + $0x50] sm:$0xff] (!%p188_p2)   ;;  %v1326_v20 = vld [vmem:[%s1630_s1 + $0x58] sm:$0xff] (!%p188_p2)  }
   0xa   : > { %v1327_v24 = vld [vmem:[%s1632_s3 + $0x40] sm:$0xff] (!%p188_p2)   ;;  %v1329_v25 = vld [vmem:[%s1632_s3 + $0x48] sm:$0xff] (!%p188_p2)   ;;  %v1331_v27 = vld [vmem:[%s1632_s3 + $0x50] sm:$0xff] (!%p188_p2)  }
   0xb   : > { %1192 = vmatpush3.bf16.msra.mxu0 (!%p188_p2), %v1317_v3  ;;  %v1328_v26 = vld [vmem:[%s1632_s3] sm:$0xff] (!%p188_p2)   ;;  %v1330_v28 = vld [vmem:[%s1632_s3 + $0x8] sm:$0xff] (!%p188_p2)   ;;  %v1333_v29 = vld [vmem:[%s1632_s3 + $0x58] sm:$0xff] (!%p188_p2)  }
   0xc   : > { %1204 = vmatpush3.bf16.msra.mxu1 (!%p188_p2), %v1318_v4  ;;  %1193 = vmatprep.subr.bf16.mxu0 (!%p188_p2), %v1367_v1  ;;  %v1332_v30 = vld [vmem:[%s1632_s3 + $0x10] sm:$0xff] (!%p188_p2)   ;;  %v1335_v31 = vld [vmem:[%s1632_s3 + $0x60] sm:$0xff] (!%p188_p2)   ;;  %v1334_v32 = vld [vmem:[%s1632_s3 + $0x18] sm:$0xff] (!%p188_p2)  }
   0xd   : > { %s1636_s19 = smov (!%p215_p3, %s1009_s19), 1  ;;  %1205 = vmatprep.subr.bf16.mxu1 %v1367_v1  ;;  %v1337_v33 = vld [vmem:[%s1632_s3 + $0x68] sm:$0xff]   ;;  %v1336_v34 = vld [vmem:[%s1632_s3 + $0x20] sm:$0xff]   ;;  %v1339_v35 = vld [vmem:[%s1632_s3 + $0x70] sm:$0xff]  }
   0xe   : > { %s1136_s30 = sshll.u32 %s1636_s19, 4  ;;  %v1338_v36 = vld [vmem:[%s1632_s3 + $0x28] sm:$0xff]   ;;  %v1341_v37 = vld [vmem:[%s1632_s3 + $0x78] sm:$0xff]   ;;  %v1340_v38 = vld [vmem:[%s1632_s3 + $0x30] sm:$0xff]   ;;  %s1137_s24 = sshll.u32 %s1636_s19, 5 }
   0xf   : > { %s219_s10 = scalar_lea.vmem %s1629_s0, %s1136_s30  ;;  %1194 = vmatpush3.bf16.msra.mxu0 %v1319_v5  ;;  %v1342_v39 = vld [vmem:[%s1632_s3 + $0x38] sm:$0xff]   ;;  %v1049_v51 = vld [vmem:[%s1631_s2] ss:$0 sm:$0xff]  ;;  %v1345_v63 = vld [vmem:[%s1632_s3 + $0xc8] sm:$0xff]   ;;  %s224_s27 = scalar_lea.vmem %s1634_s5, %s1137_s24 }
  0x10   : > { %v231_v7 = vld [vmem:[%s219_s10] sm:$0xff]  ;;  %v232_v8 = vld [vmem:[%s219_s10 + $0x8] sm:$0xff]  ;;  %1206 = vmatpush3.bf16.msra.mxu1 %v1320_v6  ;;  %1195 = vmatprep.subr.bf16.mxu0 %v1367_v1  ;;  %v1347_v4 = vld [vmem:[%s1632_s3 + $0xd0] sm:$0xff]  }
  0x11   : > { %233 = vst.msk [vmem:[#allocation2 + $0x1] sm:$0xff] %vm226_vm1, %v231_v7  ;;  %234 = vst.msk [vmem:[#allocation2 + $0x9] sm:$0xff] %vm226_vm1, %v232_v8  ;;  %1207 = vmatprep.subr.bf16.mxu1 %v1367_v1  ;;  %v1343_v61 = vld [vmem:[%s1632_s3 + $0xc0] sm:$0xff]   ;;  %v1346_v6 = vld [vmem:[%s1632_s3 + $0x88] sm:$0xff]  }
  0x12   : > { %v1344_v0 = vld [vmem:[%s1632_s3 + $0x80] sm:$0xff]   ;;  %v1349_v7 = vld [vmem:[%s1632_s3 + $0xd8] sm:$0xff]   ;;  %v1348_v8 = vld [vmem:[%s1632_s3 + $0x90] sm:$0xff]  }
  0x13   : > { %1196 = vmatpush3.bf16.msra.mxu0 %v1321_v9  ;;  %v1351_v9 = vld [vmem:[%s1632_s3 + $0xe0] sm:$0xff]  }
  0x14   : > { %1208 = vmatpush3.bf16.msra.mxu1 %v1322_v10  ;;  %1213 = vmatprep.subr.bf16.mxu0 %v1367_v1  ;;  %v1350_v10 = vld [vmem:[%s1632_s3 + $0x98] sm:$0xff]  }
  0x15   : > { %1225 = vmatprep.subr.bf16.mxu1 %v1367_v1 }
  0x18   : > { %v246_v12 = vld [vmem:[#allocation2 + $0x1] sm:$0xff]  ;;  %v247_v13 = vld [vmem:[#allocation2 + $0x9] sm:$0xff] }
  0x19   : > { %v235_v14 = vld [vmem:[#allocation2] sm:$0xff]  ;;  %v248_v15 = vpack.c.bf16 %v247_v13, %v246_v12  ;;  %v236_v16 = vld [vmem:[#allocation2 + $0x8] sm:$0xff]  ;;  %v1355_v13 = vld [vmem:[%s1632_s3 + $0xf0] sm:$0xff]  }
  0x1a   : > { %v237_v17 = vpack.c.bf16 %v236_v16, %v235_v14  ;;  %v394_v21 = vld [vmem:[#allocation2 + $0x2] sm:$0xff]  ;;  %v395_v22 = vld [vmem:[#allocation2 + $0xa] sm:$0xff] }
  0x1b   : > { %1198 = vmatmul.mubr.msk.bf16.vlgmr.msra.gmra.mrb[0].mxu0 %vm226_vm1, %v248_v15  ;;  %v396_v23 = vpack.c.bf16 %v395_v22, %v394_v21  ;;  %v1352_v12 = vld [vmem:[%s1632_s3 + $0xa0] sm:$0xff]   ;;  %v1354_v14 = vld [vmem:[%s1632_s3 + $0xa8] sm:$0xff]   ;;  %v1357_v15 = vld [vmem:[%s1632_s3 + $0xf8] sm:$0xff]  }
  0x1c   : > { %1210 = vmatmul.mubr.msk.bf16.vlgmr.msra.gmra.mrb[0].mxu1 %vm226_vm1, %v237_v17  ;;  %1214 = vmatpush3.bf16.msra.mxu0 %v1323_v11  ;;  %v1353_v11 = vld [vmem:[%s1632_s3 + $0xe8] sm:$0xff]  }
  0x1d   : > { %1215 = vmatprep.subr.bf16.mxu0 %v1367_v1  ;;  %1221 = vmatprep.mubr.msk.bf16.mxu0 %vm1368_vm0, %v1367_v1 }
  0x1e   : > { %1241 = vmatprep.mubr.msk.bf16.mxu1 %vm1368_vm0, %v1367_v1  ;;  %1226 = vmatpush3.bf16.msra.mxu1 %v1327_v24 }
  0x1f   : > { %1227 = vmatprep.subr.bf16.mxu1 %v1367_v1 }
  0x20   : > { %1216 = vmatpush3.bf16.msra.mxu0 %v1324_v18  ;;  %v1356_v18 = vld [vmem:[%s1632_s3 + $0xb0] sm:$0xff]  }
  0x21   : > { %1217 = vmatprep.subr.bf16.mxu0 %v1367_v1 }
  0x22   : > { %1228 = vmatpush3.bf16.msra.mxu1 %v1329_v25 }
  0x23   : > { %1229 = vmatprep.subr.bf16.mxu1 %v1367_v1 }
  0x24   : > { %1218 = vmatpush3.bf16.msra.mxu0 %v1325_v19 }
  0x25   : > { %1219 = vmatprep.subr.bf16.mxu0 %v1367_v1 }
  0x26   : > { %1230 = vmatpush3.bf16.msra.mxu1 %v1331_v27 }
  0x27   : > { %1231 = vmatprep.subr.bf16.mxu1 %v1367_v1 }
  0x28   : > { %1220 = vmatpush3.bf16.msra.mxu0 %v1326_v20  ;;  %v1358_v20 = vld [vmem:[%s1632_s3 + $0xb8] sm:$0xff]  }
  0x29   : > { %1245 = vmatprep.subr.bf16.mxu0 %v1367_v1 }
  0x2a   : > { %1232 = vmatpush3.bf16.msra.mxu1 %v1333_v29 }
  0x2b   : > { %1222 = vmatmul.mubr.msk.bf16.vlgmr.msra.gmra.mrb[4].mxu0 %vm226_vm1, %v396_v23  ;;  %1233 = vmatprep.subr.bf16.mxu1 %v1367_v1 }
  0x2c   : > { %1261 = vmatprep.mubr.msk.bf16.mxu0 %vm1368_vm0, %v1367_v1  ;;  %1246 = vmatpush3.bf16.msra.mxu0 %v1328_v26  ;;  %v1082_v26 = vld [vmem:[%s1633_s4] ss:$0 sm:$0xff] }
  0x2d   : > { %1247 = vmatprep.subr.bf16.mxu0 %v1367_v1 }
  0x2e   : > { %1234 = vmatpush3.bf16.msra.mxu1 %v1335_v31 }
  0x2f   : > { %1235 = vmatprep.subr.bf16.mxu1 %v1367_v1 }
  0x30   : > { %1248 = vmatpush3.bf16.msra.mxu0 %v1330_v28 }
  0x31   : > { %1249 = vmatprep.subr.bf16.mxu0 %v1367_v1 }
  0x32   : > { %1236 = vmatpush3.bf16.msra.mxu1 %v1337_v33 }
  0x33   : > { %1237 = vmatprep.subr.bf16.mxu1 %v1367_v1 }
  0x34   : > { %1250 = vmatpush3.bf16.msra.mxu0 %v1332_v30 }
  0x35   : > { %1251 = vmatprep.subr.bf16.mxu0 %v1367_v1 }
  0x36   : > { %1238 = vmatpush3.bf16.msra.mxu1 %v1339_v35 }
  0x37   : > { %1239 = vmatprep.subr.bf16.mxu1 %v1367_v1 }
  0x38   : > { %1252 = vmatpush3.bf16.msra.mxu0 %v1334_v32 }
  0x39   : > { %1253 = vmatprep.subr.bf16.mxu0 %v1367_v1 }
  0x3a   : > { %1240 = vmatpush3.bf16.msra.mxu1 %v1341_v37 }
  0x3b   : > { %1265 = vmatprep.subr.bf16.mxu1 %v1367_v1 }
  0x3c   : > { %1254 = vmatpush3.bf16.msra.mxu0 %v1336_v34 }
  0x3d   : > { %1255 = vmatprep.subr.bf16.mxu0 %v1367_v1 }
  0x40   : > { %1256 = vmatpush3.bf16.msra.mxu0 %v1338_v36 }
  0x41   : > { %1257 = vmatprep.subr.bf16.mxu0 %v1367_v1 }
  0x44   : > { %1258 = vmatpush3.bf16.msra.mxu0 %v1340_v38 }
  0x45   : > { %1259 = vmatprep.subr.bf16.mxu0 %v1367_v1 }
  0x48   : > { %1260 = vmatpush3.bf16.msra.mxu0 %v1342_v39 }
  0x49   : > { %1285 = vmatprep.subr.bf16.mxu0 %v1367_v1 }
  0xee   : > { %v319_v40 = vpop.f32.mrb[0].mxu0 }
  0xef   : > { %v387_v41 = vpop.f32.mrb[0].mxu1  ;;  %v1199_v42 = vpop.f32.mrb[1].mxu0 }
  0xf0   : > { %v388_v43 = vadd.f32 %v387_v41, %v319_v40  ;;  %v1211_v44 = vpop.f32.mrb[1].mxu1  ;;  %v322_v45 = vpop.f32.mrb[2].mxu0 }
  0xf1   : > { %v390_v46 = vpop.f32.mrb[2].mxu1  ;;  %v1200_v47 = vpop.f32.mrb[3].mxu0 }
  0xf2   : > { %v391_v48 = vadd.f32 %v390_v46, %v322_v45  ;;  %v1212_v49 = vpop.f32.mrb[3].mxu1 }
  0xfe   : > { %v467_v50 = vpop.f32.mrb[4].mxu0 }
  0xff   : > { %v474_v52 = vadd.f32 %v467_v50, %v388_v43  ;;  %v1223_v53 = vpop.f32.mrb[5].mxu0 }
 0x100   : > { %v470_v54 = vpop.f32.mrb[6].mxu0 }
 0x101   : > { %v483_v55 = vadd.f32 %v1049_v51, %v474_v52  ;;  %v475_v56 = vadd.f32 %v470_v54, %v391_v48  ;;  %v1224_v57 = vpop.f32.mrb[7].mxu0 }
 0x103   : > { %v485_v58 = vmax.f32 %v483_v55, 0.0  ;;  %v484_v59 = vadd.f32 %v1049_v51, %v475_v56 }
 0x105   : > { %490 = vst [vmem:[#allocation3 + $0x1] sm:$0xff] %v485_v58  ;;  %v486_v60 = vmax.f32 %v484_v59, 0.0 }
 0x107   : > { %491 = vst [vmem:[#allocation3 + $0x9] sm:$0xff] %v486_v60  ;;  %v513_v62 = vpack.c.bf16 %v486_v60, %v485_v58 }
 0x109   : > { %1242 = vmatmul.mubr.bf16.vlgmr.msra.gmra.mrb[4].mxu1 %v513_v62 }
 0x10a   : > { %1266 = vmatpush3.bf16.msra.mxu1 %v1343_v61  ;;  %1281 = vmatprep.mubr.msk.bf16.mxu1 %vm1368_vm0, %v1367_v1 }
 0x10b   : > { %1267 = vmatprep.subr.bf16.mxu1 %v1367_v1 }
 0x10c   : > { %v492_v2 = vld [vmem:[#allocation3] sm:$0xff] }
 0x10e   : > { %v493_v3 = vld [vmem:[#allocation3 + $0x8] sm:$0xff]  ;;  %1268 = vmatpush3.bf16.msra.mxu1 %v1345_v63 }
 0x10f   : > { %v494_v5 = vpack.c.bf16 %v493_v3, %v492_v2  ;;  %1269 = vmatprep.subr.bf16.mxu1 %v1367_v1  ;;  %v742_v16 = vld [vmem:[#allocation3 + $0x2] sm:$0xff]  ;;  %v743_v17 = vld [vmem:[#allocation3 + $0xa] sm:$0xff] }
 0x110   : > { %v744_v19 = vpack.c.bf16 %v743_v17, %v742_v16 }
 0x111   : > { %1262 = vmatmul.mubr.bf16.vlgmr.msra.gmra.mrb[8].mxu0 %v494_v5 }
 0x112   : > { %1286 = vmatpush3.bf16.msra.mxu0 %v1344_v0  ;;  %1270 = vmatpush3.bf16.msra.mxu1 %v1347_v4 }
 0x113   : > { %1287 = vmatprep.subr.bf16.mxu0 %v1367_v1  ;;  %1271 = vmatprep.subr.bf16.mxu1 %v1367_v1 }
 0x114   : > { %1301 = vmatprep.mubr.msk.bf16.mxu0 %vm1368_vm0, %v1367_v1 }
 0x116   : > { %1288 = vmatpush3.bf16.msra.mxu0 %v1346_v6  ;;  %1272 = vmatpush3.bf16.msra.mxu1 %v1349_v7 }
 0x117   : > { %1289 = vmatprep.subr.bf16.mxu0 %v1367_v1  ;;  %1273 = vmatprep.subr.bf16.mxu1 %v1367_v1 }
 0x11a   : > { %1290 = vmatpush3.bf16.msra.mxu0 %v1348_v8  ;;  %1274 = vmatpush3.bf16.msra.mxu1 %v1351_v9 }
 0x11b   : > { %1291 = vmatprep.subr.bf16.mxu0 %v1367_v1  ;;  %1275 = vmatprep.subr.bf16.mxu1 %v1367_v1 }
 0x11e   : > { %1292 = vmatpush3.bf16.msra.mxu0 %v1350_v10  ;;  %1276 = vmatpush3.bf16.msra.mxu1 %v1353_v11 }
 0x11f   : > { %1293 = vmatprep.subr.bf16.mxu0 %v1367_v1  ;;  %1277 = vmatprep.subr.bf16.mxu1 %v1367_v1 }
 0x122   : > { %1294 = vmatpush3.bf16.msra.mxu0 %v1352_v12  ;;  %1278 = vmatpush3.bf16.msra.mxu1 %v1355_v13 }
 0x123   : > { %1295 = vmatprep.subr.bf16.mxu0 %v1367_v1  ;;  %1279 = vmatprep.subr.bf16.mxu1 %v1367_v1 }
 0x126   : > { %1296 = vmatpush3.bf16.msra.mxu0 %v1354_v14  ;;  %1280 = vmatpush3.bf16.msra.mxu1 %v1357_v15 }
 0x127   : > { %1297 = vmatprep.subr.bf16.mxu0 %v1367_v1 }
 0x129   : > { %1282 = vmatmul.mubr.bf16.vlgmr.msra.gmra.mrb[8].mxu1 %v744_v19 }
 0x12a   : > { %1298 = vmatpush3.bf16.msra.mxu0 %v1356_v18 }
 0x12b   : > { %1299 = vmatprep.subr.bf16.mxu0 %v1367_v1 }
 0x12e   : > { %1300 = vmatpush3.bf16.msra.mxu0 %v1358_v20 }
 0x131   : > { %1302 = vmatmul.mubr.bf16.vlgmr.msra.gmra.mrb[12].mxu0 %v513_v62 }
 0x1dc   : > { %v613_v21 = vpop.f32.mrb[4].mxu1 }
 0x1dd   : > { %v1243_v22 = vpop.f32.mrb[5].mxu1 }
 0x1de   : > { %v616_v23 = vpop.f32.mrb[6].mxu1 }
 0x1df   : > { %v1244_v24 = vpop.f32.mrb[7].mxu1 }
 0x1e4   : > { %v702_v25 = vpop.f32.mrb[8].mxu0 }
 0x1e5   : > { %v703_v27 = vadd.f32 %v702_v25, %v613_v21  ;;  %v1263_v28 = vpop.f32.mrb[9].mxu0 }
 0x1e6   : > { %v705_v29 = vpop.f32.mrb[10].mxu0 }
 0x1e7   : > { %v716_v30 = vadd.f32 %v1082_v26, %v703_v27  ;;  %v706_v31 = vadd.f32 %v705_v29, %v616_v23  ;;  %v1264_v32 = vpop.f32.mrb[11].mxu0 }
 0x1e9   : > { %v718_v1 = vmax.f32 %v716_v30, 0.0  ;;  %v717_v33 = vadd.f32 %v1082_v26, %v706_v31 }
 0x1eb   : > { %720 = vst [vmem:[%s224_s27] sm:$0xff] %v718_v1  ;;  %v719_v34 = vmax.f32 %v717_v33, 0.0 }
 0x1ed   : > { %721 = vst [vmem:[%s224_s27 + $0x8] sm:$0xff] %v719_v34 }
 0x1fc   : > { %v844_v35 = vpop.f32.mrb[8].mxu1 }
 0x1fd   : > { %v1283_v36 = vpop.f32.mrb[9].mxu1 }
 0x1fe   : > { %v847_v37 = vpop.f32.mrb[10].mxu1 }
 0x1ff   : > { %v1284_v38 = vpop.f32.mrb[11].mxu1 }
 0x204   : > { %v933_v39 = vpop.f32.mrb[12].mxu0 }
 0x205   : > { %v934_v40 = vadd.f32 %v933_v39, %v844_v35  ;;  %v1303_v41 = vpop.f32.mrb[13].mxu0 }
 0x206   : > { %v936_v42 = vpop.f32.mrb[14].mxu0 }
 0x207   : > { %v947_v43 = vadd.f32 %v1082_v26, %v934_v40  ;;  %v937_v44 = vadd.f32 %v936_v42, %v847_v37  ;;  %v1304_v45 = vpop.f32.mrb[15].mxu0 }
 0x209   : > { %v949_v46 = vmax.f32 %v947_v43, 0.0  ;;  %v948_v47 = vadd.f32 %v1082_v26, %v937_v44 }
 0x20b   : > { %1132 = vst [vmem:[%s224_s27 + $0x10] sm:$0xff] %v949_v46  ;;  %v950_v48 = vmax.f32 %v948_v47, 0.0 }
 0x20d   : > { %1133 = vst [vmem:[%s224_s27 + $0x18] sm:$0xff] %v950_v48 }
 0x20e PF: > { %s15_s18 = sadd.s32 1, %s1365_s18  }
 0x20f   : > { %p12_p4 = scmp.ge.s32.totalorder %s15_s18, 4  }
 0x211   :  { %14 = sbr.rel (!%p12_p4) target bundleno = 1 (0x1), region = 76 }

</bundles_post_ra>
